<compile_context>
chip_gen: v7x
topology: tpu7x:2x2x1
jax: 0.10.0
libtpu: 0.0.40
codegen_flags: <defaults>
</compile_context>

<pallas_src>
import functools

import jax
import jax.numpy as jnp
from jax.experimental import pallas as pl
from jax.experimental.pallas import tpu as pltpu

LANE = 128      # lane width (last-dim tiling unit)
SUBLANE = 8     # f32 sublane width (second-to-last-dim tiling unit)


def _round_up(n, m):
    return ((n + m - 1) // m) * m


def _pick_out_tile(h_in_pad, h_out_pad, max_tile_bytes=8 << 20):
    """Largest lane-multiple output tile whose bf16 weight slab stays small."""
    for tn in (512, 256, 128):
        if h_out_pad % tn == 0 and h_in_pad * tn * 2 <= max_tile_bytes:
            return tn
    return 128


def _linear_kernel(idx_ref, x_ref, wt_ref, b_ref, o_ref):
    # y = x @ W_T + b for the selected sub-model.
    #   x_ref : [B_pad, H_in_pad]   f32 (cast to bf16 for the MXU feed)
    #   wt_ref: [H_in_pad, tn]      bf16 (pre-transposed + selected via prefetch)
    #   b_ref : [1, tn]             f32
    # idx_ref (scalar prefetch) is consumed by the index_maps, not here.
    del idx_ref
    x = x_ref[...].astype(jnp.bfloat16)
    acc = jnp.dot(x, wt_ref[...], preferred_element_type=jnp.float32)
    o_ref[...] = (acc + b_ref[...]).astype(o_ref.dtype)


@functools.partial(jax.jit, static_argnames=("H_out",))
def _ensemble_forward(x, wt_stacked, b_stacked, key, *, H_out):
    """Pick a sub-model on device and run its linear layer as one Pallas kernel."""
    B, H_in = x.shape
    n_models, H_in_pad, H_out_pad = wt_stacked.shape

    # Device-side random selection (no per-call H2D transfer of the index).
    new_key, sub = jax.random.split(key)
    if n_models > 1:
        idx = jax.random.randint(sub, (1,), 0, n_models, dtype=jnp.int32)
    else:
        idx = jnp.zeros((1,), dtype=jnp.int32)

    # Fold padding into the jit; skipped at trace time when already aligned.
    B_pad = _round_up(B, SUBLANE)
    if B_pad != B or H_in_pad != H_in:
        x = jnp.pad(x, ((0, B_pad - B), (0, H_in_pad - H_in)))

    tn = _pick_out_tile(H_in_pad, H_out_pad)
    n_tiles = H_out_pad // tn

    grid_spec = pltpu.PrefetchScalarGridSpec(
        num_scalar_prefetch=1,          # idx lands in SMEM, fed to index_maps
        grid=(n_tiles,),
        in_specs=[
            # x is resident across all output tiles.
            pl.BlockSpec((B_pad, H_in_pad), lambda j, idx_r: (0, 0)),
            # Data-dependent selection: DMA only the chosen model's weight tile.
            pl.BlockSpec((None, H_in_pad, tn), lambda j, idx_r: (idx_r[0], 0, j)),
            pl.BlockSpec((None, 1, tn), lambda j, idx_r: (idx_r[0], 0, j)),
        ],
        out_specs=pl.BlockSpec((B_pad, tn), lambda j, idx_r: (0, j)),
    )

    # VMEM budget from the actual footprint (x + double-buffered W/b/y tiles).
    x_bytes = B_pad * H_in_pad * 4
    w_tile_bytes = H_in_pad * tn * 2          # bf16 weights
    b_tile_bytes = tn * 4
    y_tile_bytes = B_pad * tn * 4
    vmem_bytes = 2 * (x_bytes + w_tile_bytes + b_tile_bytes + y_tile_bytes) + (2 << 20)
    vmem_bytes = min(max(vmem_bytes, 4 << 20), 64 << 20)

    cost = pl.CostEstimate(
        flops=2 * B_pad * H_in_pad * H_out_pad,
        transcendentals=0,
        bytes_accessed=(x_bytes + H_in_pad * H_out_pad * 2
                        + H_out_pad * 4 + B_pad * H_out_pad * 4),
    )

    y_pad = pl.pallas_call(
        _linear_kernel,
        out_shape=jax.ShapeDtypeStruct((B_pad, H_out_pad), x.dtype),
        grid_spec=grid_spec,
        compiler_params=pltpu.CompilerParams(
            dimension_semantics=("parallel",),      # megacore sharding on v7x
            vmem_limit_bytes=vmem_bytes),
        cost_estimate=cost,
    )(idx, x, wt_stacked, b_stacked)

    # Strip padding only when padding was actually applied (zero weight columns
    # and zero bias padding make the extra lanes exact zeros).
    if B_pad == B and H_out_pad == H_out:
        y = y_pad
    else:
        y = y_pad[:B, :H_out]
    return y, idx, new_key


class RedPallas:
    """JAX/Pallas equivalent of the PyTorch `Red` ensemble wrapper.

    `models` is a list of (W [H_out, H_in], b [1, H_out]) parameter tuples.
    Parameters are stacked once at init into padded, pre-transposed,
    device-resident tensors (weights in bf16, biases in f32).  Each forward
    draws a random sub-model index on device and runs one Pallas linear kernel
    on that sub-model's parameters.
    """

    def __init__(self, models, key):
        assert len(models) > 0
        ws = [w for w, _ in models]
        bs = [jnp.reshape(b, (1, -1)) for _, b in models]
        H_out, H_in = ws[0].shape
        H_out_pad = _round_up(H_out, LANE)
        H_in_pad = _round_up(H_in, LANE)

        # Pre-transpose to [H_in, H_out] (no in-kernel transpose), pad both the
        # contraction dim and output dim to lane multiples, store bf16.
        wt = jnp.stack([w.T for w in ws], axis=0)                    # [N, H_in, H_out]
        wt = jnp.pad(wt, ((0, 0), (0, H_in_pad - H_in), (0, H_out_pad - H_out)))
        b = jnp.stack(bs, axis=0)                                    # [N, 1, H_out]
        b = jnp.pad(b, ((0, 0), (0, 0), (0, H_out_pad - H_out)))

        self.wt_stacked = wt.astype(jnp.bfloat16)  # [N, H_in_pad, H_out_pad] bf16
        self.b_stacked = b.astype(jnp.float32)     # [N, 1, H_out_pad]        f32
        self.n_models = len(models)
        self.H_in = H_in
        self.H_out = H_out
        self.key = key                              # carried PRNG state (device)
        self.last_idx = None

    def __call__(self, x):
        # Same semantics as the torch module: uniform random sub-model pick per
        # forward when there is more than one sub-model, done on device.
        y, idx, self.key = _ensemble_forward(
            x, self.wt_stacked, self.b_stacked, self.key, H_out=self.H_out)
        self.last_idx = idx
        return y


if __name__ == "__main__":
    key = jax.random.PRNGKey(0)

    B, H_IN, H_OUT = 8, 32, 32      # small shapes consistent with a Linear sub-model
    N_MODELS = 3

    k_x, k_sel, *k_models = jax.random.split(key, 2 + 2 * N_MODELS)
    x = jax.random.normal(k_x, (B, H_IN), dtype=jnp.float32)

    models = []
    for m in range(N_MODELS):
        kw, kb = k_models[2 * m], k_models[2 * m + 1]
        w = jax.random.normal(kw, (H_OUT, H_IN), dtype=jnp.float32) * 0.05
        b = jax.random.normal(kb, (1, H_OUT), dtype=jnp.float32) * 0.01
        models.append((w, b))

    red = RedPallas(models, key=k_sel)

    # Run once (random sub-model selection happens on device).
    y = red(x)
    y = jax.block_until_ready(y)

    # Sanity check against a plain-JAX f32 reference for the selected model.
    sel = int(red.last_idx[0])
    assert 0 <= sel < N_MODELS
    w_sel, b_sel = models[sel]
    y_ref = x @ w_sel.T + b_sel

    assert y.shape == (B, H_OUT)
    # Tolerance covers bf16 weight storage / bf16 MXU feed with f32 accumulation
    # at this contraction depth.
    assert jnp.allclose(y, y_ref, atol=1e-2, rtol=1e-2), \
        "Pallas output mismatch vs reference"

    print("KERNEL_OK")
</pallas_src>

<mosaic_0001>
module attributes {stable_mosaic.version = 11 : i64} {
  func.func @_linear_kernel(%arg0: i32, %arg1: memref<1xi32, #tpu.memory_space<smem>>, %arg2: memref<8x128xf32, #tpu.memory_space<vmem>>, %arg3: memref<1x128x128xbf16, #tpu.memory_space<vmem>>, %arg4: memref<1x1x128xf32, #tpu.memory_space<vmem>>, %arg5: memref<8x128xf32, #tpu.memory_space<vmem>>) attributes {dimension_semantics = [#tpu.dimension_semantics<parallel>], iteration_bounds = array<i64: 1>, scalar_prefetch = 1 : i64, scratch_operands = 0 : i64, tpu.core_type = #tpu.core_type<tc>, window_params = [{pipeline_mode = #tpu.pipeline_mode<synchronous>, transform_indices = @transform_0, window_bounds = array<i64: 8, 128>}, {transform_indices = @transform_1, window_bounds = array<i64: 1, 128, 128>}, {transform_indices = @transform_2, window_bounds = array<i64: 1, 1, 128>}, {transform_indices = @transform_3, window_bounds = array<i64: 8, 128>}]} {
    %c0 = arith.constant 0 : index
    %c0_0 = arith.constant 0 : index
    %0 = vector.load %arg2[%c0, %c0_0] : memref<8x128xf32, #tpu.memory_space<vmem>>, vector<8x128xf32>
    %1 = arith.truncf %0 : vector<8x128xf32> to vector<8x128xbf16>
    %c0_1 = arith.constant 0 : index
    %c0_2 = arith.constant 0 : index
    %c0_3 = arith.constant 0 : index
    %2 = vector.load %arg3[%c0_1, %c0_2, %c0_3] : memref<1x128x128xbf16, #tpu.memory_space<vmem>>, vector<1x128x128xbf16>
    %3 = vector.shape_cast %2 : vector<1x128x128xbf16> to vector<128x128xbf16>
    %cst = arith.constant dense<0.000000e+00> : vector<8x128xf32>
    %4 = tpu.matmul %1, %3, %cst {dimension_numbers = #tpu.dot_dimension_numbers<[1], [0], [0], [1], [0, 0, 1, 1], [], []>} : vector<8x128xbf16>, vector<128x128xbf16>, vector<8x128xf32> -> vector<8x128xf32>
    %c0_4 = arith.constant 0 : index
    %c0_5 = arith.constant 0 : index
    %c0_6 = arith.constant 0 : index
    %5 = vector.load %arg4[%c0_4, %c0_5, %c0_6] : memref<1x1x128xf32, #tpu.memory_space<vmem>>, vector<1x1x128xf32>
    %6 = vector.shape_cast %5 : vector<1x1x128xf32> to vector<1x128xf32>
    %7 = vector.broadcast %6 : vector<1x128xf32> to vector<8x128xf32>
    %8 = arith.addf %4, %7 : vector<8x128xf32>
    %c0_7 = arith.constant 0 : index
    %c0_8 = arith.constant 0 : index
    %9 = vector.load %arg5[%c0_7, %c0_8] : memref<8x128xf32, #tpu.memory_space<vmem>>, vector<8x128xf32>
    tpu.vector_store %arg5[%c0_7, %c0_8], %8 {strides = array<i32>} : memref<8x128xf32, #tpu.memory_space<vmem>>, vector<8x128xf32>,
    return
  }
  func.func @transform_0(%arg0: i32, %arg1: memref<1xi32, #tpu.memory_space<smem>>) -> (i32, i32) {
    %c0_i32 = arith.constant 0 : i32
    %c0_i32_0 = arith.constant 0 : i32
    %c0_i32_1 = arith.constant 0 : i32
    return %c0_i32, %c0_i32_0 : i32, i32
  }
  func.func @transform_1(%arg0: i32, %arg1: memref<1xi32, #tpu.memory_space<smem>>) -> (i32, i32, i32) {
    %c0 = arith.constant 0 : index
    %0 = memref.load %arg1[%c0] : memref<1xi32, #tpu.memory_space<smem>>
    %c0_i32 = arith.constant 0 : i32
    %c0_i32_0 = arith.constant 0 : i32
    return %0, %c0_i32, %arg0 : i32, i32, i32
  }
  func.func @transform_2(%arg0: i32, %arg1: memref<1xi32, #tpu.memory_space<smem>>) -> (i32, i32, i32) {
    %c0 = arith.constant 0 : index
    %0 = memref.load %arg1[%c0] : memref<1xi32, #tpu.memory_space<smem>>
    %c0_i32 = arith.constant 0 : i32
    %c0_i32_0 = arith.constant 0 : i32
    return %0, %c0_i32, %arg0 : i32, i32, i32
  }
  func.func @transform_3(%arg0: i32, %arg1: memref<1xi32, #tpu.memory_space<smem>>) -> (i32, i32) {
    %c0_i32 = arith.constant 0 : i32
    %c0_i32_0 = arith.constant 0 : i32
    return %c0_i32, %arg0 : i32, i32
  }
}

</mosaic_0001>

<bundles_post_ra>
// kernel: _ensemble_forward.1
= control target key start
LH: loop header
LB: loop body
LE: loop exit
PB: predicated region body
PF: predicated region fallthrough
CT: control target
= control target key end

     0   :  { %s324_s0 = inlined_call_operand.<no memory space> [shape: s32[1], index: 0, kind: input, shape index: {}]   ;;  %s325_s1 = inlined_call_operand.vmem [shape: f32[8,128], index: 1, kind: input, shape index: {}]   ;;  %s326_s2 = inlined_call_operand.vmem [shape: bf16[3,128,128], index: 2, kind: input, shape index: {}]   ;;  %s327_s3 = inlined_call_operand.vmem [shape: f32[3,1,128], index: 3, kind: input, shape index: {}]   ;;  %s328_s4 = inlined_call_operand.hbm [shape: f32[8,128], index: 4, kind: output, shape index: {}]  }
   0x1   :  { %p40_p0 = scmp.lt.s32.totalorder %s324_s0, 2 }
   0x2   :  { %10 = vsyncpa [#allocation5], 0  ;;  %v265_v0 = vmov 0.0   ;;  %vm266_vm0 = vmmov 0   ;;  %v52_v9 = vld [vmem:[%s325_s1] sm:$0xff]  ;;  %s267_s27 = smov [#allocation4]  }
   0x3   :  { %210 = vmatprep.subr.bf16.mxu0 %v265_v0  ;;  %226 = vmatprep.mubr.msk.bf16.mxu0 %vm266_vm0, %v265_v0  ;;  %s330_s0 = smov (!%p40_p0, %s324_s0), 2  ;;  %v53_v10 = vpack.c.bf16 %v52_v9, %v52_v9  ;;  %s172_s28 = sshll.u32 %s267_s27, 4  ;;  %s173_s28 = int_to_ptr.vmem [resolvable:$true] %s172_s28 }
   0x4   :  { %s200_s19 = sshll.u32 %s330_s0, 6  ;;  %s49_s26 = scalar_lea.vmem %s327_s3, %s330_s0 }
   0x5   :  { %s44_s22 = scalar_lea.vmem %s326_s2, %s200_s19  ;;  %v191_v11 = vld [vmem:[%s49_s26] ss:$0 sm:$0xff]  ;;  %s241_s29 = scalar_lea.vmem %s173_s28, 128 }
   0x6   :  { %v233_v1 = vld [vmem:[%s44_s22] sm:$0xff]   ;;  %v234_v2 = vld [vmem:[%s44_s22 + $0x8] sm:$0xff]   ;;  %v235_v3 = vld [vmem:[%s44_s22 + $0x10] sm:$0xff]   ;;  %p242_p1 = scmp.ne.s32.totalorder %s173_s28, %s241_s29  ;;  %p246_p2 = scmp.lt.s32.totalorder %s173_s28, %s173_s28 }
   0x7   :  { %211 = vmatpush3.bf16.msra.mxu0 %v233_v1  ;;  %v236_v4 = vld [vmem:[%s44_s22 + $0x18] sm:$0xff]   ;;  %v237_v5 = vld [vmem:[%s44_s22 + $0x20] sm:$0xff]   ;;  %v238_v6 = vld [vmem:[%s44_s22 + $0x28] sm:$0xff]   ;;  %p247_p3 = scmp.lt.s32.totalorder %s241_s29, %s241_s29 }
   0x8   :  { %212 = vmatprep.subr.bf16.mxu0 %v265_v0  ;;  %v239_v7 = vld [vmem:[%s44_s22 + $0x30] sm:$0xff]   ;;  %v240_v8 = vld [vmem:[%s44_s22 + $0x38] sm:$0xff]  }
   0x9   :  { %p248_p4 = por %p247_p3, %p246_p2 }
   0xb   :  { %213 = vmatpush3.bf16.msra.mxu0 %v234_v2  ;;  %p249_p5 = pnand %p248_p4, %p242_p1 }
   0xc   :  { %214 = vmatprep.subr.bf16.mxu0 %v265_v0 }
   0xf   :  { %215 = vmatpush3.bf16.msra.mxu0 %v235_v3 }
  0x10   :  { %216 = vmatprep.subr.bf16.mxu0 %v265_v0 }
  0x13   :  { %217 = vmatpush3.bf16.msra.mxu0 %v236_v4 }
  0x14   :  { %218 = vmatprep.subr.bf16.mxu0 %v265_v0 }
  0x17   :  { %219 = vmatpush3.bf16.msra.mxu0 %v237_v5 }
  0x18   :  { %220 = vmatprep.subr.bf16.mxu0 %v265_v0 }
  0x1b   :  { %221 = vmatpush3.bf16.msra.mxu0 %v238_v6 }
  0x1c   :  { %222 = vmatprep.subr.bf16.mxu0 %v265_v0 }
  0x1f   :  { %223 = vmatpush3.bf16.msra.mxu0 %v239_v7 }
  0x20   :  { %224 = vmatprep.subr.bf16.mxu0 %v265_v0 }
  0x23   :  { %225 = vmatpush3.bf16.msra.mxu0 %v240_v8 }
  0x26   :  { %227 = vmatmul.mubr.bf16.vlgmr.msra.gmra.mrb[0].mxu0 %v53_v10 }
  0xf9   :  { %v159_v12 = vpop.f32.mrb[0].mxu0 }
  0xfa   :  { %v160_v13 = vadd.f32 %v191_v11, %v159_v12  ;;  %v228_v14 = vpop.f32.mrb[1].mxu0 }
  0xfb   :  { %v162_v15 = vpop.f32.mrb[2].mxu0 }
  0xfc   :  { %165 = vst [vmem:[#allocation4] sm:$0xff] %v160_v13  ;;  %v229_v16 = vpop.f32.mrb[3].mxu0 }
  0xfd   :  { %252 = shalt.err (!%p249_p5)
}
  0xfe   :  { %s253_s0 = scalar_lea.hbm %s328_s4, 128 }
  0xff   :  { %p254_p6 = scmp.ne.s32.totalorder %s328_s4, %s253_s0  ;;  %p257_p7 = scmp.lt.u32.totalorder %s253_s0, %s328_s4 }
 0x101   :  { %p259_p8 = pnand %p257_p7, %p254_p6 }
 0x103   :  { %262 = shalt.err (!%p259_p8)
}
 0x104   :  { %175 = dma.vmem_to_hbm [thread:$0]  %s173_s28, 128, %s328_s4, [#allocation5]  }
 0x105   :  { %263 = dma.done.wait [#allocation5], 128  }
 0x106   :  { %264 = vsyncadd [#allocation5], 4294967168 }
 0x107   :  { %179 = vsyncpa [#allocation5], 1 }

</bundles_post_ra>
